<compile_context>
chip_gen: v5e
topology: v5e:2x2
jax: 0.10.0
libtpu: 0.0.40
codegen_flags: <defaults>
</compile_context>

<pallas_src>
import functools
import numpy as np
import jax
import jax.numpy as jnp
from jax import lax
from jax.experimental import pallas as pl
from jax.experimental.pallas import tpu as pltpu

LANE = 128
PACK = 32   # bits packed per int32 word in the stream kernel output


# ----------------------------------------------------------------------------
# Host-side init helpers (verbatim ports of the reference numpy functions)
# ----------------------------------------------------------------------------
def search_best_stab_parallel_numpy(P_low_L, P_high_L, L, seach_range):
    max_stab_len = np.ones_like(P_low_L)
    max_stab_len.fill(L.item(0))
    max_stab_R = np.ones_like(P_low_L)
    max_stab_l_p = np.ones_like(P_low_L)
    for i in range(seach_range.item(0) + 1):
        p_L = np.clip(P_low_L + i, None, P_high_L)
        l_p = L / np.gcd(p_L, L)
        l_p_by_p_L_minus_P_low_L = l_p * i
        l_p_by_P_high_L_min_p_L = l_p * (P_high_L - p_L)
        l_p_by_p_L_minus_P_low_L[l_p_by_p_L_minus_P_low_L == 0] = 1
        l_p_by_P_high_L_min_p_L[l_p_by_P_high_L_min_p_L == 0] = 1
        B_L = 0
        p_L_eq_P_low_L = (p_L == P_low_L).astype('float32')
        P_low_L_le_B_L = (P_low_L <= B_L).astype('float32')
        R_low = p_L_eq_P_low_L * ((1 - P_low_L_le_B_L) * L) + \
            (1 - p_L_eq_P_low_L) * (P_low_L - B_L) / l_p_by_p_L_minus_P_low_L
        P_high_L_eq_p_L = (P_high_L == p_L).astype('float32')
        B_L_le_P_high_L = (B_L <= P_high_L).astype('float32')
        R_high = P_high_L_eq_p_L * ((1 - B_L_le_P_high_L) * L) + \
            (1 - P_high_L_eq_p_L) * (B_L - P_high_L) / l_p_by_P_high_L_min_p_L
        R_0 = np.ceil(np.maximum(R_low, R_high))
        B_L = L
        p_L_eq_P_low_L = (p_L == P_low_L).astype('float32')
        P_low_L_le_B_L = (P_low_L <= B_L).astype('float32')
        R_low = p_L_eq_P_low_L * ((1 - P_low_L_le_B_L) * L) + \
            (1 - p_L_eq_P_low_L) * (P_low_L - B_L) / l_p_by_p_L_minus_P_low_L
        P_high_L_eq_p_L = (P_high_L == p_L).astype('float32')
        B_L_le_P_high_L = (B_L <= P_high_L).astype('float32')
        R_high = P_high_L_eq_p_L * ((1 - B_L_le_P_high_L) * L) + \
            (1 - P_high_L_eq_p_L) * (B_L - P_high_L) / l_p_by_P_high_L_min_p_L
        R_L = np.ceil(np.maximum(R_low, R_high))
        R = np.minimum(R_0, R_L)
        R_by_l_p = R * l_p
        R_by_l_p_lt_max_stab_len = (R_by_l_p < max_stab_len).astype('float32')
        max_stab_len = R_by_l_p_lt_max_stab_len * np.maximum(R_by_l_p, 1)
        max_stab_R = R_by_l_p_lt_max_stab_len * R
        max_stab_l_p = R_by_l_p_lt_max_stab_len * l_p
    return (max_stab_len.astype('float32'),
            max_stab_R.astype('float32'),
            max_stab_l_p.astype('float32'))


def bit_reverse_rng(bitwidth):
    # Deterministic stand-in for RNG(rng='Sobol', dim=1): a permutation of
    # [0, 2^bitwidth) produced by bit-reversal (van der Corput / Sobol dim-1).
    # TODO(synk): a general Sobol direction-number generator (or LFSR/SYS rng
    # modes) is host-side init glue and is not reimplemented here.
    L = 1 << bitwidth
    idx = np.arange(L, dtype=np.int64)
    rev = np.zeros(L, dtype=np.int64)
    for b in range(bitwidth):
        rev |= ((idx >> b) & 1) << (bitwidth - 1 - b)
    return rev.astype(np.float32)


# ----------------------------------------------------------------------------
# NSbuilder init (host glue, pure numpy) + device state slabs
# ----------------------------------------------------------------------------
def nsbuilder_init(value, bitwidth=8, mode='bipolar', normstability=0.5,
                   threshold=0.05):
    value = np.asarray(value, dtype=np.float32)
    if mode == 'bipolar':
        val = (value + 1.0) / 2.0
        T = threshold / 2.0
    else:
        val = value
        T = threshold
    L = np.float32(2 ** bitwidth)

    P_low = np.maximum(val - T, np.zeros_like(val))
    P_up = np.minimum(np.ones_like(val), val + T)
    upper = np.minimum(np.ceil(L * P_up), L)
    lower = np.maximum(np.floor(L * P_low), np.float32(0.0))
    seach_range = np.array([T * 2 * L + 1], dtype=np.float32).astype(np.int32)

    max_stab_len, max_stab_R, max_stab_l_p = search_best_stab_parallel_numpy(
        lower.astype(np.int32), upper.astype(np.int32),
        np.array([L], dtype=np.int32), seach_range)

    max_stable = max_stab_len
    max_st_len = L - max_stable
    new_st_len = np.ceil(max_st_len * normstability)
    new_ns_len = L - new_st_len

    val_gt_half = (val > 0.5).astype(np.float32)
    new_ns_one = val_gt_half * (P_up * (new_ns_len + 1)) + \
        (1 - val_gt_half) * np.maximum(P_low * (new_ns_len + 1) - 1,
                                       np.float32(0.0))
    new_st_one = val * L - new_ns_one
    with np.errstate(divide='ignore', invalid='ignore'):
        new_ns_val = new_ns_one / new_ns_len
        new_st_val = new_st_one / new_st_len
        # SourceGen (unipolar): round(prob * 2^bitwidth)
        src_st = np.round(new_st_val * L).astype(np.float32)
        src_ns = np.round(new_ns_val * L).astype(np.float32)

    rng = bit_reverse_rng(bitwidth)                       # (L,) float32, ref only
    out_cnt_ns = np.zeros_like(val, dtype=np.int32)
    out_cnt_st = np.zeros_like(val, dtype=np.int32)

    # ---- device slabs (built once; kernels compare in int32) ----
    n_elem = int(np.prod(val.shape))
    assert n_elem % LANE == 0, "element count must be a multiple of 128"
    rows = n_elem // LANE
    Li = int(L)

    def _guarded_int_slab(src):
        # Guard NaN/inf lanes (new_ns_len==0 / new_st_len==0 divides) so the
        # int32 compare against rng in [0, L-1] matches the float compare:
        #   NaN -> 0 (always False), +inf/>L -> L (always True),
        #   -inf/negative -> 0 (always False).
        s = np.asarray(src, np.float64)
        s = np.where(np.isnan(s), 0.0, s)
        s = np.clip(s, 0.0, float(Li))
        return jnp.asarray(s.astype(np.int32).reshape(rows, LANE))

    dev = dict(
        rows=rows,
        src_st=_guarded_int_slab(src_st),
        src_ns=_guarded_int_slab(src_ns),
        ns_len=jnp.asarray(new_ns_len.astype(np.int32).reshape(rows, LANE)),
        cnt_ns=jnp.asarray(out_cnt_ns.reshape(rows, LANE)),
        cnt_st=jnp.asarray(out_cnt_st.reshape(rows, LANE)),
    )

    return dict(
        src_st=src_st, src_ns=src_ns,
        new_ns_len_i32=new_ns_len.astype(np.int32),
        out_cnt_ns=out_cnt_ns, out_cnt_st=out_cnt_st,
        rng=rng, L=Li, bitwidth=int(bitwidth),
        val_shape=val.shape, dev=dev,
    )


# ----------------------------------------------------------------------------
# In-kernel helpers
# ----------------------------------------------------------------------------
def _bit_reverse(x, bitwidth):
    """Reverse the low `bitwidth` bits of x (values already masked).
    Butterfly (log2(bitwidth) shift/and/or stages) for power-of-two widths,
    per-bit fallback otherwise.  Pure VPU work."""
    if bitwidth > 1 and (bitwidth & (bitwidth - 1)) == 0:
        shift = bitwidth >> 1
        while shift:
            mask = 0
            for g in range(0, bitwidth, 2 * shift):
                mask |= ((1 << shift) - 1) << g
            x = ((x & mask) << shift) | ((x >> shift) & mask)
            shift >>= 1
        return x
    rev = jnp.zeros_like(x)
    for b in range(bitwidth):
        rev = rev | (((x >> b) & 1) << (bitwidth - 1 - b))
    return rev


def _one_bit(src_st, src_ns, ns_len, cnt_ns, cnt_st, bitwidth, Lm1):
    """One NSbuilder step.  Select the active source/counter FIRST, then a
    single bit-reverse + single int32 compare.  rng is the bit-reversal
    permutation, so rng[cnt % L] == bit_reverse(cnt & (L-1))."""
    st_gen = cnt_ns >= ns_len
    cnt_a = jnp.where(st_gen, cnt_st, cnt_ns)
    src_a = jnp.where(st_gen, src_st, src_ns)
    bit = (src_a > _bit_reverse(cnt_a & Lm1, bitwidth)).astype(jnp.int32)
    st_i = st_gen.astype(jnp.int32)
    return bit, st_i, cnt_ns + (1 - st_i), cnt_st + st_i


# ----------------------------------------------------------------------------
# Pallas kernels
# ----------------------------------------------------------------------------
def make_step_kernel(bitwidth):
    Lm1 = (1 << bitwidth) - 1

    def kernel(src_st_ref, src_ns_ref, ns_len_ref, cnt_ns_ref, cnt_st_ref,
               out_ref, cnt_ns_o_ref, cnt_st_o_ref, ns_gen_ref, st_gen_ref):
        bit, st_i, cnt_ns, cnt_st = _one_bit(
            src_st_ref[...], src_ns_ref[...], ns_len_ref[...],
            cnt_ns_ref[...], cnt_st_ref[...], bitwidth, Lm1)
        out_ref[...] = bit.astype(jnp.float32)
        cnt_ns_o_ref[...] = cnt_ns
        cnt_st_o_ref[...] = cnt_st
        ns_gen_ref[...] = 1 - st_i
        st_gen_ref[...] = st_i

    return kernel


def make_stream_kernel(bitwidth, n_steps):
    Lm1 = (1 << bitwidth) - 1
    n_full = n_steps // PACK
    rem = n_steps % PACK

    def kernel(src_st_ref, src_ns_ref, ns_len_ref, cnt_ns_ref, cnt_st_ref,
               bits_ref, cnt_ns_o_ref, cnt_st_o_ref):
        src_st = src_st_ref[...]
        src_ns = src_ns_ref[...]
        ns_len = ns_len_ref[...]

        def pack_word(n_bits, cnt_ns, cnt_st):
            packed = jnp.zeros_like(cnt_ns)
            # Static Python unroll: static shift amounts + cross-iteration ILP
            # across the 4 VALU slots (the body is pure VALU work).
            for t in range(n_bits):
                bit, _, cnt_ns, cnt_st = _one_bit(
                    src_st, src_ns, ns_len, cnt_ns, cnt_st, bitwidth, Lm1)
                packed = packed | (bit << t)
            return packed, cnt_ns, cnt_st

        def word_body(w, carry):
            cnt_ns, cnt_st = carry
            packed, cnt_ns, cnt_st = pack_word(PACK, cnt_ns, cnt_st)
            bits_ref[w] = packed            # one vst per 32 generated bits
            return cnt_ns, cnt_st

        cnt_ns, cnt_st = lax.fori_loop(
            0, n_full, word_body, (cnt_ns_ref[...], cnt_st_ref[...]))
        if rem:
            packed, cnt_ns, cnt_st = pack_word(rem, cnt_ns, cnt_st)
            bits_ref[n_full] = packed
        cnt_ns_o_ref[...] = cnt_ns
        cnt_st_o_ref[...] = cnt_st

    return kernel


# ----------------------------------------------------------------------------
# Cached pallas_call builders + wrappers
# ----------------------------------------------------------------------------
@functools.lru_cache(maxsize=None)
def _build_step_call(bitwidth, rows):
    tile = pl.BlockSpec((rows, LANE), lambda i: (0, 0))
    out_shapes = (
        jax.ShapeDtypeStruct((rows, LANE), jnp.float32),   # output bit (float)
        jax.ShapeDtypeStruct((rows, LANE), jnp.int32),     # out_cnt_ns
        jax.ShapeDtypeStruct((rows, LANE), jnp.int32),     # out_cnt_st
        jax.ShapeDtypeStruct((rows, LANE), jnp.int32),     # ns_gen
        jax.ShapeDtypeStruct((rows, LANE), jnp.int32),     # st_gen
    )
    return pl.pallas_call(
        make_step_kernel(bitwidth),
        out_shape=out_shapes,
        grid=(1,),
        in_specs=[tile] * 5,
        out_specs=tuple([tile] * 5),
        compiler_params=pltpu.CompilerParams(
            dimension_semantics=("arbitrary",)),
    )


@functools.lru_cache(maxsize=None)
def _build_stream_call(bitwidth, rows, n_steps, block_rows):
    n_words = pl.cdiv(n_steps, PACK)
    row_spec = pl.BlockSpec((block_rows, LANE), lambda i: (i, 0))
    bits_spec = pl.BlockSpec((n_words, block_rows, LANE), lambda i: (0, i, 0))
    out_shapes = (
        jax.ShapeDtypeStruct((n_words, rows, LANE), jnp.int32),  # packed bits
        jax.ShapeDtypeStruct((rows, LANE), jnp.int32),           # final cnt_ns
        jax.ShapeDtypeStruct((rows, LANE), jnp.int32),           # final cnt_st
    )
    return pl.pallas_call(
        make_stream_kernel(bitwidth, n_steps),
        out_shape=out_shapes,
        grid=(rows // block_rows,),
        in_specs=[row_spec] * 5,
        out_specs=(bits_spec, row_spec, row_spec),
        compiler_params=pltpu.CompilerParams(
            dimension_semantics=("parallel",)),
    )


def _default_block_rows(rows):
    """rows/2 on v7x (two TensorCores share the 'parallel' row grid); full rows
    (grid=(1,)) on single-TC v5e/v6e to avoid the extra serial grid step."""
    try:
        kind = jax.devices()[0].device_kind.lower()
    except Exception:
        kind = ""
    if "v7" in kind and rows % 16 == 0:
        return rows // 2
    return rows


def nsbuilder_forward(state):
    """One NSbuilder forward step (matches module.forward()).  All state stays
    on device; ns_gen/st_gen are produced in-kernel (no host-side deltas)."""
    dev = state["dev"]
    fn = _build_step_call(state["bitwidth"], dev["rows"])
    out, cnt_ns, cnt_st, ns_gen, st_gen = fn(
        dev["src_st"], dev["src_ns"], dev["ns_len"],
        dev["cnt_ns"], dev["cnt_st"])
    shp = state["val_shape"]
    return (out.reshape(shp), cnt_ns.reshape(shp), cnt_st.reshape(shp),
            ns_gen.reshape(shp), st_gen.reshape(shp))


def nsbuilder_forward_stream(state, n_steps=None, block_rows=None):
    """Run `n_steps` forward steps inside ONE pallas_call (state resident in
    VMEM).  The bitstream is bit-packed 32 steps per int32 word:
    returned shape (ceil(n_steps/32), rows, 128) int32."""
    dev = state["dev"]
    rows = dev["rows"]
    if n_steps is None:
        n_steps = state["L"]
    if block_rows is None:
        block_rows = _default_block_rows(rows)
    if rows % block_rows != 0 or block_rows % 8 != 0:
        block_rows = rows
    fn = _build_stream_call(state["bitwidth"], rows, int(n_steps), block_rows)
    packed, cnt_ns, cnt_st = fn(dev["src_st"], dev["src_ns"], dev["ns_len"],
                                dev["cnt_ns"], dev["cnt_st"])
    shp = state["val_shape"]
    return packed, cnt_ns.reshape(shp), cnt_st.reshape(shp)


def unpack_bitstream(packed, n_steps, val_shape):
    """Host-side unpack of the packed (n_words, rows, 128) int32 bitstream into
    (n_steps,)+val_shape float32 (verification / float consumers)."""
    p = np.asarray(packed).view(np.uint32)
    t = np.arange(n_steps)
    bits = (p[t // PACK] >> (t % PACK).astype(np.uint32)[:, None, None]) & 1
    return bits.astype(np.float32).reshape((n_steps,) + tuple(val_shape))


# ----------------------------------------------------------------------------
# Reference (numpy) for verification
# ----------------------------------------------------------------------------
def nsbuilder_step_ref(src_st, src_ns, ns_len, cnt_ns, cnt_st, rng, L):
    with np.errstate(invalid='ignore'):
        bs_st = (src_st > rng[cnt_st % L]).astype(np.int32)
        bs_ns = (src_ns > rng[cnt_ns % L]).astype(np.int32)
    ge = (cnt_ns >= ns_len).astype(np.int32)
    ns_gen = 1 - ge
    st_gen = ge
    out = (ns_gen & bs_ns) | (st_gen & bs_st)
    return (out.astype(np.float32),
            cnt_ns + ns_gen, cnt_st + st_gen, ns_gen, st_gen)


if __name__ == "__main__":
    key = jax.random.PRNGKey(0)
    # bipolar input value in (-1, 1), shape (2, 4, 16, 16) -> 2048 elements
    value = np.asarray(
        jax.random.uniform(key, (2, 4, 16, 16), jnp.float32,
                           minval=-0.99, maxval=0.99))

    state = nsbuilder_init(value, bitwidth=8, mode='bipolar',
                           normstability=0.5, threshold=0.05)
    L = state["L"]
    rng = state["rng"]

    # ---- single forward step (module.forward()) ----
    output, cnt_ns, cnt_st, ns_gen, st_gen = nsbuilder_forward(state)
    jax.block_until_ready(output)

    out_ref, cnt_ns_ref, cnt_st_ref, ns_gen_ref, st_gen_ref = nsbuilder_step_ref(
        state["src_st"], state["src_ns"], state["new_ns_len_i32"],
        state["out_cnt_ns"], state["out_cnt_st"], rng, L)
    np.testing.assert_allclose(np.asarray(output), out_ref, atol=0, rtol=0)
    np.testing.assert_array_equal(np.asarray(cnt_ns), cnt_ns_ref)
    np.testing.assert_array_equal(np.asarray(cnt_st), cnt_st_ref)
    np.testing.assert_array_equal(np.asarray(ns_gen), ns_gen_ref)
    np.testing.assert_array_equal(np.asarray(st_gen), st_gen_ref)

    # ---- full L-step bitstream inside one pallas_call (bit-packed output) ----
    n_steps = L
    packed, fin_cnt_ns, fin_cnt_st = nsbuilder_forward_stream(state, n_steps)
    jax.block_until_ready(packed)
    bits = unpack_bitstream(packed, n_steps, state["val_shape"])

    c_ns = state["out_cnt_ns"].copy()
    c_st = state["out_cnt_st"].copy()
    bits_ref = np.zeros((n_steps,) + state["val_shape"], dtype=np.float32)
    for t in range(n_steps):
        bits_ref[t], c_ns, c_st, _, _ = nsbuilder_step_ref(
            state["src_st"], state["src_ns"], state["new_ns_len_i32"],
            c_ns, c_st, rng, L)
    np.testing.assert_allclose(bits, bits_ref, atol=0, rtol=0)
    np.testing.assert_array_equal(np.asarray(fin_cnt_ns), c_ns)
    np.testing.assert_array_equal(np.asarray(fin_cnt_st), c_st)

    print("KERNEL_OK")
</pallas_src>

<mosaic_0001>
module attributes {stable_mosaic.version = 11 : i64} {
  func.func @kernel(%arg0: i32, %arg1: memref<16x128xi32, #tpu.memory_space<vmem>>, %arg2: memref<16x128xi32, #tpu.memory_space<vmem>>, %arg3: memref<16x128xi32, #tpu.memory_space<vmem>>, %arg4: memref<16x128xi32, #tpu.memory_space<vmem>>, %arg5: memref<16x128xi32, #tpu.memory_space<vmem>>, %arg6: memref<16x128xf32, #tpu.memory_space<vmem>>, %arg7: memref<16x128xi32, #tpu.memory_space<vmem>>, %arg8: memref<16x128xi32, #tpu.memory_space<vmem>>, %arg9: memref<16x128xi32, #tpu.memory_space<vmem>>, %arg10: memref<16x128xi32, #tpu.memory_space<vmem>>) attributes {dimension_semantics = [#tpu.dimension_semantics<arbitrary>], iteration_bounds = array<i64: 1>, scalar_prefetch = 0 : i64, scratch_operands = 0 : i64, tpu.core_type = #tpu.core_type<tc>, window_params = [{pipeline_mode = #tpu.pipeline_mode<synchronous>, transform_indices = @transform_0, window_bounds = array<i64: 16, 128>}, {pipeline_mode = #tpu.pipeline_mode<synchronous>, transform_indices = @transform_1, window_bounds = array<i64: 16, 128>}, {pipeline_mode = #tpu.pipeline_mode<synchronous>, transform_indices = @transform_2, window_bounds = array<i64: 16, 128>}, {pipeline_mode = #tpu.pipeline_mode<synchronous>, transform_indices = @transform_3, window_bounds = array<i64: 16, 128>}, {pipeline_mode = #tpu.pipeline_mode<synchronous>, transform_indices = @transform_4, window_bounds = array<i64: 16, 128>}, {pipeline_mode = #tpu.pipeline_mode<synchronous>, transform_indices = @transform_5, window_bounds = array<i64: 16, 128>}, {pipeline_mode = #tpu.pipeline_mode<synchronous>, transform_indices = @transform_6, window_bounds = array<i64: 16, 128>}, {pipeline_mode = #tpu.pipeline_mode<synchronous>, transform_indices = @transform_7, window_bounds = array<i64: 16, 128>}, {pipeline_mode = #tpu.pipeline_mode<synchronous>, transform_indices = @transform_8, window_bounds = array<i64: 16, 128>}, {pipeline_mode = #tpu.pipeline_mode<synchronous>, transform_indices = @transform_9, window_bounds = array<i64: 16, 128>}]} {
    %c0 = arith.constant 0 : index
    %c0_0 = arith.constant 0 : index
    %0 = vector.load %arg1[%c0, %c0_0] : memref<16x128xi32, #tpu.memory_space<vmem>>, vector<16x128xi32>
    %c0_1 = arith.constant 0 : index
    %c0_2 = arith.constant 0 : index
    %1 = vector.load %arg2[%c0_1, %c0_2] : memref<16x128xi32, #tpu.memory_space<vmem>>, vector<16x128xi32>
    %c0_3 = arith.constant 0 : index
    %c0_4 = arith.constant 0 : index
    %2 = vector.load %arg3[%c0_3, %c0_4] : memref<16x128xi32, #tpu.memory_space<vmem>>, vector<16x128xi32>
    %c0_5 = arith.constant 0 : index
    %c0_6 = arith.constant 0 : index
    %3 = vector.load %arg4[%c0_5, %c0_6] : memref<16x128xi32, #tpu.memory_space<vmem>>, vector<16x128xi32>
    %c0_7 = arith.constant 0 : index
    %c0_8 = arith.constant 0 : index
    %4 = vector.load %arg5[%c0_7, %c0_8] : memref<16x128xi32, #tpu.memory_space<vmem>>, vector<16x128xi32>
    %5 = arith.cmpi sge, %3, %2 : vector<16x128xi32>
    %6 = arith.select %5, %4, %3 : vector<16x128xi1>, vector<16x128xi32>
    %7 = arith.select %5, %0, %1 : vector<16x128xi1>, vector<16x128xi32>
    %c255_i32 = arith.constant 255 : i32
    %8 = vector.broadcast %c255_i32 : i32 to vector<16x128xi32>
    %9 = arith.andi %6, %8 : vector<16x128xi32>
    %c15_i32 = arith.constant 15 : i32
    %10 = vector.broadcast %c15_i32 : i32 to vector<16x128xi32>
    %11 = arith.andi %9, %10 : vector<16x128xi32>
    %c4_i32 = arith.constant 4 : i32
    %12 = vector.broadcast %c4_i32 : i32 to vector<16x128xi32>
    %13 = arith.shli %11, %12 : vector<16x128xi32>
    %c4_i32_9 = arith.constant 4 : i32
    %14 = vector.broadcast %c4_i32_9 : i32 to vector<16x128xi32>
    %15 = arith.shrsi %9, %14 : vector<16x128xi32>
    %c15_i32_10 = arith.constant 15 : i32
    %16 = vector.broadcast %c15_i32_10 : i32 to vector<16x128xi32>
    %17 = arith.andi %15, %16 : vector<16x128xi32>
    %18 = arith.ori %13, %17 : vector<16x128xi32>
    %c51_i32 = arith.constant 51 : i32
    %19 = vector.broadcast %c51_i32 : i32 to vector<16x128xi32>
    %20 = arith.andi %18, %19 : vector<16x128xi32>
    %c2_i32 = arith.constant 2 : i32
    %21 = vector.broadcast %c2_i32 : i32 to vector<16x128xi32>
    %22 = arith.shli %20, %21 : vector<16x128xi32>
    %c2_i32_11 = arith.constant 2 : i32
    %23 = vector.broadcast %c2_i32_11 : i32 to vector<16x128xi32>
    %24 = arith.shrsi %18, %23 : vector<16x128xi32>
    %c51_i32_12 = arith.constant 51 : i32
    %25 = vector.broadcast %c51_i32_12 : i32 to vector<16x128xi32>
    %26 = arith.andi %24, %25 : vector<16x128xi32>
    %27 = arith.ori %22, %26 : vector<16x128xi32>
    %c85_i32 = arith.constant 85 : i32
    %28 = vector.broadcast %c85_i32 : i32 to vector<16x128xi32>
    %29 = arith.andi %27, %28 : vector<16x128xi32>
    %c1_i32 = arith.constant 1 : i32
    %30 = vector.broadcast %c1_i32 : i32 to vector<16x128xi32>
    %31 = arith.shli %29, %30 : vector<16x128xi32>
    %c1_i32_13 = arith.constant 1 : i32
    %32 = vector.broadcast %c1_i32_13 : i32 to vector<16x128xi32>
    %33 = arith.shrsi %27, %32 : vector<16x128xi32>
    %c85_i32_14 = arith.constant 85 : i32
    %34 = vector.broadcast %c85_i32_14 : i32 to vector<16x128xi32>
    %35 = arith.andi %33, %34 : vector<16x128xi32>
    %36 = arith.ori %31, %35 : vector<16x128xi32>
    %37 = arith.cmpi sgt, %7, %36 : vector<16x128xi32>
    %38 = arith.extui %37 : vector<16x128xi1> to vector<16x128xi32>
    %39 = arith.extui %5 : vector<16x128xi1> to vector<16x128xi32>
    %c1_i32_15 = arith.constant 1 : i32
    %40 = vector.broadcast %c1_i32_15 : i32 to vector<16x128xi32>
    %41 = arith.subi %40, %39 : vector<16x128xi32>
    %42 = arith.addi %3, %41 : vector<16x128xi32>
    %43 = arith.addi %4, %39 : vector<16x128xi32>
    %44 = arith.sitofp %38 : vector<16x128xi32> to vector<16x128xf32>
    %c0_16 = arith.constant 0 : index
    %c0_17 = arith.constant 0 : index
    %45 = vector.load %arg6[%c0_16, %c0_17] : memref<16x128xf32, #tpu.memory_space<vmem>>, vector<16x128xf32>
    tpu.vector_store %arg6[%c0_16, %c0_17], %44 {strides = array<i32>} : memref<16x128xf32, #tpu.memory_space<vmem>>, vector<16x128xf32>,
    %c0_18 = arith.constant 0 : index
    %c0_19 = arith.constant 0 : index
    %46 = vector.load %arg7[%c0_18, %c0_19] : memref<16x128xi32, #tpu.memory_space<vmem>>, vector<16x128xi32>
    tpu.vector_store %arg7[%c0_18, %c0_19], %42 {strides = array<i32>} : memref<16x128xi32, #tpu.memory_space<vmem>>, vector<16x128xi32>,
    %c0_20 = arith.constant 0 : index
    %c0_21 = arith.constant 0 : index
    %47 = vector.load %arg8[%c0_20, %c0_21] : memref<16x128xi32, #tpu.memory_space<vmem>>, vector<16x128xi32>
    tpu.vector_store %arg8[%c0_20, %c0_21], %43 {strides = array<i32>} : memref<16x128xi32, #tpu.memory_space<vmem>>, vector<16x128xi32>,
    %c1_i32_22 = arith.constant 1 : i32
    %48 = vector.broadcast %c1_i32_22 : i32 to vector<16x128xi32>
    %49 = arith.subi %48, %39 : vector<16x128xi32>
    %c0_23 = arith.constant 0 : index
    %c0_24 = arith.constant 0 : index
    %50 = vector.load %arg9[%c0_23, %c0_24] : memref<16x128xi32, #tpu.memory_space<vmem>>, vector<16x128xi32>
    tpu.vector_store %arg9[%c0_23, %c0_24], %49 {strides = array<i32>} : memref<16x128xi32, #tpu.memory_space<vmem>>, vector<16x128xi32>,
    %c0_25 = arith.constant 0 : index
    %c0_26 = arith.constant 0 : index
    %51 = vector.load %arg10[%c0_25, %c0_26] : memref<16x128xi32, #tpu.memory_space<vmem>>, vector<16x128xi32>
    tpu.vector_store %arg10[%c0_25, %c0_26], %39 {strides = array<i32>} : memref<16x128xi32, #tpu.memory_space<vmem>>, vector<16x128xi32>,
    return
  }
  func.func @transform_0(%arg0: i32) -> (i32, i32) {
    %c0_i32 = arith.constant 0 : i32
    %c0_i32_0 = arith.constant 0 : i32
    %c0_i32_1 = arith.constant 0 : i32
    return %c0_i32, %c0_i32_0 : i32, i32
  }
  func.func @transform_1(%arg0: i32) -> (i32, i32) {
    %c0_i32 = arith.constant 0 : i32
    %c0_i32_0 = arith.constant 0 : i32
    %c0_i32_1 = arith.constant 0 : i32
    return %c0_i32, %c0_i32_0 : i32, i32
  }
  func.func @transform_2(%arg0: i32) -> (i32, i32) {
    %c0_i32 = arith.constant 0 : i32
    %c0_i32_0 = arith.constant 0 : i32
    %c0_i32_1 = arith.constant 0 : i32
    return %c0_i32, %c0_i32_0 : i32, i32
  }
  func.func @transform_3(%arg0: i32) -> (i32, i32) {
    %c0_i32 = arith.constant 0 : i32
    %c0_i32_0 = arith.constant 0 : i32
    %c0_i32_1 = arith.constant 0 : i32
    return %c0_i32, %c0_i32_0 : i32, i32
  }
  func.func @transform_4(%arg0: i32) -> (i32, i32) {
    %c0_i32 = arith.constant 0 : i32
    %c0_i32_0 = arith.constant 0 : i32
    %c0_i32_1 = arith.constant 0 : i32
    return %c0_i32, %c0_i32_0 : i32, i32
  }
  func.func @transform_5(%arg0: i32) -> (i32, i32) {
    %c0_i32 = arith.constant 0 : i32
    %c0_i32_0 = arith.constant 0 : i32
    %c0_i32_1 = arith.constant 0 : i32
    return %c0_i32, %c0_i32_0 : i32, i32
  }
  func.func @transform_6(%arg0: i32) -> (i32, i32) {
    %c0_i32 = arith.constant 0 : i32
    %c0_i32_0 = arith.constant 0 : i32
    %c0_i32_1 = arith.constant 0 : i32
    return %c0_i32, %c0_i32_0 : i32, i32
  }
  func.func @transform_7(%arg0: i32) -> (i32, i32) {
    %c0_i32 = arith.constant 0 : i32
    %c0_i32_0 = arith.constant 0 : i32
    %c0_i32_1 = arith.constant 0 : i32
    return %c0_i32, %c0_i32_0 : i32, i32
  }
  func.func @transform_8(%arg0: i32) -> (i32, i32) {
    %c0_i32 = arith.constant 0 : i32
    %c0_i32_0 = arith.constant 0 : i32
    %c0_i32_1 = arith.constant 0 : i32
    return %c0_i32, %c0_i32_0 : i32, i32
  }
  func.func @transform_9(%arg0: i32) -> (i32, i32) {
    %c0_i32 = arith.constant 0 : i32
    %c0_i32_0 = arith.constant 0 : i32
    %c0_i32_1 = arith.constant 0 : i32
    return %c0_i32, %c0_i32_0 : i32, i32
  }
}

</mosaic_0001>

<bundles_post_ra>
// kernel: tpu_custom_call.1
= control target key start
LH: loop header
LB: loop body
LE: loop exit
PB: predicated region body
PF: predicated region fallthrough
CT: control target
= control target key end

     0   :  { %15 = vsyncpa [#allocation3], 0  ;;  %s714_s0 = inlined_call_operand.hbm [shape: s32[16,128], index: 0, kind: input, shape index: {}]   ;;  %s715_s1 = inlined_call_operand.hbm [shape: s32[16,128], index: 1, kind: input, shape index: {}]   ;;  %s716_s2 = inlined_call_operand.hbm [shape: s32[16,128], index: 2, kind: input, shape index: {}]   ;;  %s717_s3 = inlined_call_operand.hbm [shape: s32[16,128], index: 3, kind: input, shape index: {}]   ;;  %s718_s4 = inlined_call_operand.hbm [shape: s32[16,128], index: 4, kind: input, shape index: {}]   ;;  %s719_s5 = inlined_call_operand.hbm [shape: f32[16,128], index: 5, kind: output, shape index: {0}]   ;;  %s720_s6 = inlined_call_operand.hbm [shape: s32[16,128], index: 6, kind: output, shape index: {1}]   ;;  %s721_s7 = inlined_call_operand.hbm [shape: s32[16,128], index: 7, kind: output, shape index: {2}]   ;;  %s722_s8 = inlined_call_operand.hbm [shape: s32[16,128], index: 8, kind: output, shape index: {3}]   ;;  %s723_s9 = inlined_call_operand.hbm [shape: s32[16,128], index: 9, kind: output, shape index: {4}]  }
   0x1   :  { %16 = vsyncpa [#allocation6], 0 }
   0x2   :  { %17 = vsyncpa [#allocation9], 0 }
   0x3   :  { %18 = vsyncpa [#allocation4], 0 }
   0x4   :  { %19 = vsyncpa [#allocation13], 0 }
   0x5   :  { %20 = vsyncpa [#allocation16], 0  ;;  %s38_s11 = sshll.u32 %s715_s1, 4  ;;  %s537_s12 = smov [#allocation5]   ;;  %s39_s11 = int_to_ptr.hbm [resolvable:$true] %s38_s11 }
   0x6   :  { %s40_s13 = sshll.u32 %s537_s12, 4  ;;  %s64_s16 = sshll.u32 %s717_s3, 4  ;;  %s41_s13 = int_to_ptr.vmem [resolvable:$true] %s40_s13  ;;  %s65_s16 = int_to_ptr.hbm [resolvable:$true] %s64_s16 }
   0x7   :  { %s538_s17 = smov 128   ;;  %s539_s18 = smov 8  }
   0x8   :  { %46 = dma.hbm_to_vmem [thread:$0]  %s39_s11, 256, %s41_s13, [#allocation6], %s538_s17, %s538_s17, %s539_s18  }
   0x9   :  { %s540_s19 = smov [#allocation8]   ;;  %s25_s1 = sshll.u32 %s714_s0, 4  ;;  %s26_s1 = int_to_ptr.hbm [resolvable:$true] %s25_s1 }
   0xa   :  { %s66_s20 = sshll.u32 %s540_s19, 4  ;;  %s51_s24 = sshll.u32 %s716_s2, 4  ;;  %s67_s20 = int_to_ptr.vmem [resolvable:$true] %s66_s20  ;;  %s52_s24 = int_to_ptr.hbm [resolvable:$true] %s51_s24 }
   0xb   :  { %72 = dma.hbm_to_vmem [thread:$0]  %s65_s16, 256, %s67_s20, [#allocation9], %s538_s17, %s538_s17, %s539_s18  }
   0xc   :  { %s541_s25 = smov [#allocation2]   ;;  %s542_s27 = smov [#allocation7]  }
   0xd   :  { %s27_s26 = sshll.u32 %s541_s25, 4  ;;  %s53_s0 = sshll.u32 %s542_s27, 4  ;;  %s28_s26 = int_to_ptr.vmem [resolvable:$true] %s27_s26  ;;  %s54_s0 = int_to_ptr.vmem [resolvable:$true] %s53_s0 }
   0xe   :  { %33 = dma.hbm_to_vmem [thread:$0]  %s26_s1, 256, %s28_s26, [#allocation3], %s538_s17, %s538_s17, %s539_s18  }
   0xf   :  { %s77_s30 = sshll.u32 %s718_s4, 4  ;;  %s543_s2 = smov [#allocation10]   ;;  %s78_s30 = int_to_ptr.hbm [resolvable:$true] %s77_s30 }
  0x10   :  { %59 = dma.hbm_to_vmem [thread:$0]  %s52_s24, 256, %s54_s0, [#allocation6], %s538_s17, %s538_s17, %s539_s18  }
  0x11   :  { %s79_s10 = sshll.u32 %s543_s2, 4  ;;  %s80_s10 = int_to_ptr.vmem [resolvable:$true] %s79_s10 }
  0x12   :  { %85 = dma.hbm_to_vmem [thread:$0]  %s78_s30, 256, %s80_s10, [#allocation9], %s538_s17, %s538_s17, %s539_s18  }
  0x13   :  { %525 = dma.done.wait [#allocation3], 256  }
  0x14   :  { %526 = vsyncadd [#allocation3], 4294967040 }
  0x15   :  { %527 = dma.done.wait [#allocation6], 512  }
  0x16   :  { %528 = vsyncadd [#allocation6], 4294966784 }
  0x17   :  { %529 = dma.done.wait [#allocation9], 512  }
  0x18   :  { %530 = vsyncadd [#allocation9], 4294966784  ;;  %s197_s12 = sshll.u32 %s720_s6, 4  ;;  %s544_s13 = smov [#allocation12]   ;;  %v641_v0 = vld [vmem:[#allocation7] sm:$0xff]  ;;  %v643_v1 = vld [vmem:[#allocation8] sm:$0xff]  ;;  %s645_s12 = int_to_ptr.hbm [resolvable:$true] %s197_s12 }
  0x19   :  { %s634_s14 = sshll.u32 %s544_s13, 4  ;;  %s545_s15 = smov [#allocation15]   ;;  %v114_v2 = vld [vmem:[#allocation10] sm:$0xff]  ;;  %vm116_vm0 = vcmp.ge.s32.totalorder %v643_v1, %v641_v0  ;;  %v649_v3 = vld [vmem:[#allocation7 + $0x8] sm:$0xff]  ;;  %v651_v4 = vld [vmem:[#allocation8 + $0x8] sm:$0xff]  ;;  %v546_v7 = vmov 0   ;;  %s196_s14 = int_to_ptr.vmem [resolvable:$true] %s634_s14 }
  0x1a   :  { %s636_s16 = sshll.u32 %s545_s15, 4  ;;  %s223_s21 = sshll.u32 %s722_s8, 4  ;;  %v115_v5 = vld [vmem:[#allocation10 + $0x8] sm:$0xff]  ;;  %v118_v6 = vsel %vm116_vm0, %v114_v2, %v643_v1  ;;  %v156_v8 = vsel %vm116_vm0, 1, %v546_v7  ;;  %vm117_vm1 = vcmp.ge.s32.totalorder %v651_v4, %v649_v3  ;;  %v106_v39 = vld [vmem:[#allocation2] sm:$0xff]  ;;  %v108_v40 = vld [vmem:[#allocation5] sm:$0xff]  ;;  %s222_s16 = int_to_ptr.vmem [resolvable:$true] %s636_s16  ;;  %s664_s21 = int_to_ptr.hbm [resolvable:$true] %s223_s21 }
  0x1b   :  { %s547_s6 = smov [#allocation14]   ;;  %v122_v9 = vand.u32 255, %v118_v6  ;;  %v158_v10 = vsub.s32 1, %v156_v8  ;;  %176 = vst [vmem:[#allocation17] sm:$0xff] %v156_v8  ;;  %v119_v11 = vsel %vm117_vm1, %v115_v5, %v651_v4  ;;  %v157_v12 = vsel %vm117_vm1, 1, %v546_v7  ;;  %s210_s3 = sshll.u32 %s721_s7, 4  ;;  %s211_s3 = int_to_ptr.hbm [resolvable:$true] %s210_s3 }
  0x1c   :  { %s666_s8 = sshll.u32 %s547_s6, 4  ;;  %v123_v13 = vand.u32 255, %v119_v11  ;;  %v159_v14 = vsub.s32 1, %v157_v12  ;;  %177 = vst [vmem:[#allocation17 + $0x8] sm:$0xff] %v157_v12  ;;  %s548_s23 = smov [#allocation17]   ;;  %v162_v18 = vadd.s32 %v156_v8, %v114_v2  ;;  %v163_v22 = vadd.s32 %v157_v12, %v115_v5  ;;  %v107_v43 = vld [vmem:[#allocation2 + $0x8] sm:$0xff]  ;;  %s209_s8 = int_to_ptr.vmem [resolvable:$true] %s666_s8 }
  0x1d   :  { %s234_s24 = sshll.u32 %s548_s23, 4  ;;  %s236_s27 = sshll.u32 %s723_s9, 4  ;;  %v124_v15 = vand.u32 15, %v122_v9  ;;  %v128_v16 = vshra.s32 %v122_v9, 4  ;;  %v160_v17 = vadd.s32 %v158_v10, %v643_v1  ;;  %174 = vst [vmem:[#allocation15] sm:$0xff] %v158_v10  ;;  %v109_v44 = vld [vmem:[#allocation5 + $0x8] sm:$0xff]  ;;  %v120_v49 = vsel %vm116_vm0, %v106_v39, %v108_v40  ;;  %s235_s24 = int_to_ptr.vmem [resolvable:$true] %s234_s24  ;;  %s237_s27 = int_to_ptr.hbm [resolvable:$true] %s236_s27 }
  0x1e   :  { %v125_v19 = vand.u32 15, %v123_v13  ;;  %v129_v20 = vshra.s32 %v123_v13, 4  ;;  %v161_v21 = vadd.s32 %v159_v14, %v651_v4  ;;  %175 = vst [vmem:[#allocation15 + $0x8] sm:$0xff] %v159_v14  ;;  %v121_v53 = vsel %vm117_vm1, %v107_v43, %v109_v44  ;;  %s549_s7 = smov [#allocation11]   ;;  %s184_s29 = sshll.u32 %s719_s5, 4  ;;  %s185_s29 = int_to_ptr.hbm [resolvable:$true] %s184_s29 }
  0x1f   :  { %v126_v23 = vshll.u32 %v124_v15, 4  ;;  %v130_v24 = vand.u32 15, %v128_v16  ;;  %170 = vst [vmem:[#allocation12] sm:$0xff] %v160_v17  ;;  %229 = dma.vmem_to_hbm [thread:$0]  %s222_s16, 256, %s664_s21, [#allocation16], %s538_s17, %s538_s17, %s539_s18   ;;  %v550_v55 = vmov 0.0  }
  0x20   :  { %v127_v25 = vshll.u32 %v125_v19, 4  ;;  %v131_v26 = vand.u32 15, %v129_v20  ;;  %171 = vst [vmem:[#allocation12 + $0x8] sm:$0xff] %v161_v21  ;;  %242 = dma.vmem_to_hbm [thread:$0]  %s235_s24, 256, %s237_s27, [#allocation16], %s538_s17, %s538_s17, %s539_s18  }
  0x21   :  { %v132_v27 = vor.u32 %v130_v24, %v126_v23  ;;  %172 = vst [vmem:[#allocation14] sm:$0xff] %v162_v18  ;;  %203 = dma.vmem_to_hbm [thread:$0]  %s196_s14, 256, %s645_s12, [#allocation13], %s538_s17, %s538_s17, %s539_s18  }
  0x22   :  { %v133_v28 = vor.u32 %v131_v26, %v127_v25  ;;  %173 = vst [vmem:[#allocation14 + $0x8] sm:$0xff] %v163_v22  ;;  %s182_s9 = sshll.u32 %s549_s7, 4  ;;  %s183_s9 = int_to_ptr.vmem [resolvable:$true] %s182_s9 }
  0x23   :  { %v134_v29 = vand.u32 51, %v132_v27  ;;  %v138_v30 = vshra.s32 %v132_v27, 2  ;;  %216 = dma.vmem_to_hbm [thread:$0]  %s209_s8, 256, %s211_s3, [#allocation13], %s538_s17, %s538_s17, %s539_s18  }
  0x24   :  { %v135_v31 = vand.u32 51, %v133_v28  ;;  %v139_v32 = vshra.s32 %v133_v28, 2 }
  0x25   :  { %v136_v33 = vshll.u32 %v134_v29, 2  ;;  %v140_v34 = vand.u32 51, %v138_v30 }
  0x26   :  { %v137_v35 = vshll.u32 %v135_v31, 2  ;;  %v141_v36 = vand.u32 51, %v139_v32 }
  0x27   :  { %v142_v37 = vor.u32 %v140_v34, %v136_v33 }
  0x28   :  { %v143_v38 = vor.u32 %v141_v36, %v137_v35 }
  0x29   :  { %v144_v41 = vand.u32 85, %v142_v37  ;;  %v148_v42 = vshra.s32 %v142_v37, 1 }
  0x2a   :  { %v145_v45 = vand.u32 85, %v143_v38  ;;  %v149_v46 = vshra.s32 %v143_v38, 1 }
  0x2b   :  { %v146_v47 = vshll.u32 %v144_v41, 1  ;;  %v150_v48 = vand.u32 85, %v148_v42 }
  0x2c   :  { %v147_v50 = vshll.u32 %v145_v45, 1  ;;  %v151_v51 = vand.u32 85, %v149_v46 }
  0x2d   :  { %v152_v52 = vor.u32 %v150_v48, %v146_v47 }
  0x2e   :  { %v153_v54 = vor.u32 %v151_v51, %v147_v50 }
  0x2f   :  { %vm154_vm2 = vcmp.gt.s32.totalorder %v120_v49, %v152_v52 }
  0x30   :  { %v269_v56 = vsel %vm154_vm2, 1.0, %v550_v55  ;;  %vm155_vm3 = vcmp.gt.s32.totalorder %v121_v53, %v153_v54 }
  0x31   :  { %168 = vst [vmem:[#allocation11] sm:$0xff] %v269_v56  ;;  %v270_v57 = vsel %vm155_vm3, 1.0, %v550_v55 }
  0x32   :  { %169 = vst [vmem:[#allocation11 + $0x8] sm:$0xff] %v270_v57 }
  0x33   :  { %190 = dma.vmem_to_hbm [thread:$0]  %s183_s9, 256, %s185_s29, [#allocation4], %s538_s17, %s538_s17, %s539_s18  }
  0x34   :  { %531 = dma.done.wait [#allocation4], 256  }
  0x35   :  { %532 = vsyncadd [#allocation4], 4294967040 }
  0x36   :  { %533 = dma.done.wait [#allocation13], 512  }
  0x37   :  { %534 = vsyncadd [#allocation13], 4294966784 }
  0x38   :  { %535 = dma.done.wait [#allocation16], 512  }
  0x39   :  { %536 = vsyncadd [#allocation16], 4294966784 }
  0x3a   :  { %263 = vsyncpa [#allocation3], 1 }
  0x3b   :  { %264 = vsyncpa [#allocation6], 1 }
  0x3c   :  { %265 = vsyncpa [#allocation9], 1 }
  0x3d   :  { %266 = vsyncpa [#allocation4], 1 }
  0x3e   :  { %267 = vsyncpa [#allocation13], 1 }
  0x3f   :  { %268 = vsyncpa [#allocation16], 1 }

</bundles_post_ra>
